<compile_context>
chip_gen: v6e
topology: v6e:2x2x1
jax: 0.10.0
libtpu: 0.0.40
codegen_flags: <defaults>
</compile_context>

<pallas_src>
import functools

import jax
import jax.numpy as jnp
from jax.experimental import pallas as pl
from jax.experimental.pallas import tpu as pltpu

EPS = 1e-5          # nn.BatchNorm1d default
NEG_SLOPE = 0.02    # leaky_relu slope used by the module
DROP_P = 0.5        # F.dropout p

# Inter-layer activation dtype.  jnp.bfloat16 halves HBM traffic on v6e/v7x
# (stats/matmul still accumulate in f32); keep f32 for bit-faithful numerics.
ACT_DTYPE = jnp.float32


def _pick_tm(m_rows, max_tm=512):
    """Largest divisor of M that is a multiple of 8 and <= max_tm."""
    best = None
    for t in range(8, min(m_rows, max_tm) + 1, 8):
        if m_rows % t == 0:
            best = t
    return best if best is not None else m_rows


def _keep_mask(shape, row_offset, n_cols, seed):
    """Counter-based Bernoulli(1 - DROP_P) keep mask (murmur-style finalizer).

    Pure jnp ops so it lowers on TPU *and* under CPU interpret mode.
    Each element hashes its global (row, col) index with a per-layer seed,
    so blocks and layers never reuse a mask.
    """
    rows = jax.lax.broadcasted_iota(jnp.int32, shape, 0) + row_offset
    cols = jax.lax.broadcasted_iota(jnp.int32, shape, 1)
    h = (rows * jnp.int32(n_cols) + cols).astype(jnp.uint32)
    h = h ^ jnp.uint32(seed & 0xFFFFFFFF)
    h = h * jnp.uint32(0x9E3779B9)
    h = h ^ (h >> 15)
    h = h * jnp.uint32(0x85EBCA6B)
    h = h ^ (h >> 13)
    h = h * jnp.uint32(0xC2B2AE35)
    h = h ^ (h >> 16)
    # Top 24 bits -> uniform in [0, 1); keep with probability 1 - DROP_P.
    u = (h >> 8).astype(jnp.int32).astype(jnp.float32) * jnp.float32(1.0 / (1 << 24))
    return u >= jnp.float32(DROP_P)


# ------------------- fused (BN+act+dropout) -> Linear -> stats ----------------
def _fused_layer_kernel(x_ref, w_ref, scale_ref, shift_ref,
                        y_ref, sum_ref, sq_ref, *,
                        apply_prologue, apply_dropout, layer_seed, block_rows):
    i = pl.program_id(0)
    x = x_ref[...].astype(jnp.float32)

    if apply_prologue:
        # Previous layer's BatchNorm affine (precomputed scale/shift) + leaky_relu.
        z = x * scale_ref[...] + shift_ref[...]
        z = jnp.where(z >= 0.0, z, jnp.float32(NEG_SLOPE) * z)
        if apply_dropout:
            keep = _keep_mask(z.shape, i * block_rows, z.shape[1], layer_seed)
            z = jnp.where(keep, z * jnp.float32(1.0 / (1.0 - DROP_P)),
                          jnp.float32(0.0))
        x = z

    # Full-K matmul; weight block is resident in VMEM (constant index_map).
    y = jnp.dot(x, w_ref[...], preferred_element_type=jnp.float32)
    y_ref[...] = y.astype(y_ref.dtype)

    # Fused per-feature statistics for the BatchNorm that follows this Linear.
    @pl.when(i == 0)
    def _():
        sum_ref[...] = jnp.zeros_like(sum_ref)
        sq_ref[...] = jnp.zeros_like(sq_ref)

    sum_ref[...] += jnp.sum(y, axis=0, keepdims=True)
    sq_ref[...] += jnp.sum(y * y, axis=0, keepdims=True)


def fused_linear_layer(x, w, scale, shift, *, apply_prologue, apply_dropout,
                       layer_seed, tm):
    """y = act(x) @ w  (no bias: BN after every Linear cancels it exactly).

    Returns (y [M,H], col_sum [1,H], col_sumsq [1,H])."""
    M, K = x.shape
    Kw, H = w.shape
    assert K == Kw and M % tm == 0
    kern = functools.partial(
        _fused_layer_kernel,
        apply_prologue=apply_prologue,
        apply_dropout=apply_dropout,
        layer_seed=layer_seed,
        block_rows=tm,
    )
    return pl.pallas_call(
        kern,
        out_shape=(jax.ShapeDtypeStruct((M, H), x.dtype),
                   jax.ShapeDtypeStruct((1, H), jnp.float32),
                   jax.ShapeDtypeStruct((1, H), jnp.float32)),
        grid_spec=pltpu.PrefetchScalarGridSpec(
            num_scalar_prefetch=0,
            grid=(M // tm,),
            in_specs=[
                pl.BlockSpec((tm, K), lambda i: (i, 0)),
                pl.BlockSpec((K, H), lambda i: (0, 0)),   # weight stays resident
                pl.BlockSpec((1, K), lambda i: (0, 0)),
                pl.BlockSpec((1, K), lambda i: (0, 0)),
            ],
            out_specs=(
                pl.BlockSpec((tm, H), lambda i: (i, 0)),
                pl.BlockSpec((1, H), lambda i: (0, 0)),   # resident accumulator
                pl.BlockSpec((1, H), lambda i: (0, 0)),   # resident accumulator
            ),
        ),
        compiler_params=pltpu.CompilerParams(
            # Stats accumulators require sequential traversal of the M axis.
            dimension_semantics=("arbitrary",)),
    )(x, w, scale, shift)


# -------------------------- final BN affine + leaky ---------------------------
def _bn_act_kernel(y_ref, scale_ref, shift_ref, o_ref):
    z = y_ref[...].astype(jnp.float32) * scale_ref[...] + shift_ref[...]
    o_ref[...] = jnp.where(z >= 0.0, z, jnp.float32(NEG_SLOPE) * z).astype(o_ref.dtype)


def bn_leaky(y, scale, shift, *, tm):
    M, H = y.shape
    return pl.pallas_call(
        _bn_act_kernel,
        out_shape=jax.ShapeDtypeStruct((M, H), y.dtype),
        grid_spec=pltpu.PrefetchScalarGridSpec(
            num_scalar_prefetch=0,
            grid=(M // tm,),
            in_specs=[pl.BlockSpec((tm, H), lambda i: (i, 0)),
                      pl.BlockSpec((1, H), lambda i: (0, 0)),
                      pl.BlockSpec((1, H), lambda i: (0, 0))],
            out_specs=pl.BlockSpec((tm, H), lambda i: (i, 0)),
        ),
        compiler_params=pltpu.CompilerParams(
            # Pure elementwise pass: let v7x's 2 TensorCores split the rows.
            dimension_semantics=("parallel",)),
    )(y, scale, shift)


def _bn_scale_shift(col_sum, col_sq, m_rows, gamma, beta):
    """Training-mode BN (batch stats, biased variance) folded to scale/shift."""
    mean = col_sum / m_rows
    var = col_sq / m_rows - mean * mean
    inv_std = jax.lax.rsqrt(var + EPS)
    scale = gamma.reshape(1, -1) * inv_std
    shift = beta.reshape(1, -1) - mean * scale
    return scale, shift


# --------------------------------- MLP module ---------------------------------
def init_params(key, in_feature, hidden_feature, out_feature, num_layers=4):
    keys = jax.random.split(key, num_layers + 1)
    dims = [(in_feature, hidden_feature)] + \
           [(hidden_feature, hidden_feature)] * (num_layers - 1)
    linears = []
    for i, (fin, fout) in enumerate(dims):
        bound = 1.0 / (fin ** 0.5)
        # Stored [fin, fout] (transpose of torch's [out, in]).  Linear biases are
        # omitted on purpose: every Linear is immediately followed by BatchNorm,
        # which subtracts the per-feature mean, so the bias cancels exactly.
        linears.append(jax.random.uniform(keys[i], (fin, fout), jnp.float32,
                                          -bound, bound))
    bound = 1.0 / (hidden_feature ** 0.5)
    w_out = jax.random.uniform(keys[-1], (hidden_feature, out_feature),
                               jnp.float32, -bound, bound)
    return dict(
        linears=linears,
        out=w_out,
        bn1=(jnp.ones((hidden_feature,), jnp.float32),
             jnp.zeros((hidden_feature,), jnp.float32)),
        bn2=(jnp.ones((out_feature,), jnp.float32),
             jnp.zeros((out_feature,), jnp.float32)),
    )


def mlp_forward(params, x, seed=0):
    """x: [B, T, W, in_feature]  ->  [B, T, W, out_feature]"""
    B, T, W, F = x.shape
    out = x.reshape(-1, F).astype(ACT_DTYPE)            # [M, F], M = B*T*W
    M = out.shape[0]
    tm = _pick_tm(M)

    g1, b1 = params["bn1"]
    g2, b2 = params["bn2"]
    weights = list(params["linears"]) + [params["out"]]
    n_hidden = len(params["linears"])

    # Identity prologue for the first Linear.
    scale = jnp.ones((1, F), jnp.float32)
    shift = jnp.zeros((1, F), jnp.float32)

    for li, w in enumerate(weights):
        # Non-additive per-layer seed: no block/layer mask collisions.
        layer_seed = (((int(seed) & 0xFFFFFFFF) * 0x9E3779B1
                       + li * 0x85EBCA6B) & 0xFFFFFFFF)
        out, col_sum, col_sq = fused_linear_layer(
            out, w, scale, shift,
            apply_prologue=(li > 0),          # BN+act(+dropout) of previous layer
            apply_dropout=(li > 0),           # dropout follows every hidden layer
            layer_seed=layer_seed, tm=tm)
        gamma, beta = (g1, b1) if li < n_hidden else (g2, b2)
        scale, shift = _bn_scale_shift(col_sum, col_sq, M, gamma, beta)

    # Head epilogue: bn2 + leaky_relu (no dropout).
    out = bn_leaky(out, scale, shift, tm=tm)
    out_feature = out.shape[1]
    return out.reshape(B, -1, W, out_feature).astype(x.dtype)   # == view(b,-1,W,out)


if __name__ == "__main__":
    # Small shapes consistent with the module's [B, T, num_windows, in_feature].
    B, T, W = 2, 3, 8                                  # M = B*T*W = 48 rows
    in_feature, hidden_feature, out_feature = 128, 128, 128   # lane-dense output

    key = jax.random.PRNGKey(0)
    kx, kp = jax.random.split(key)
    x = jax.random.normal(kx, (B, T, W, in_feature), dtype=jnp.float32)
    params = init_params(kp, in_feature, hidden_feature, out_feature, num_layers=4)

    y = mlp_forward(params, x, seed=0)
    y = jax.block_until_ready(y)
    assert y.shape == (B, T, W, out_feature), y.shape
    assert bool(jnp.all(jnp.isfinite(y)))
    print("KERNEL_OK")
</pallas_src>

<mosaic_0001>
module attributes {stable_mosaic.version = 11 : i64} {
  func.func @_fused_layer_kernel(%arg0: i32, %arg1: memref<48x128xf32, #tpu.memory_space<vmem>>, %arg2: memref<128x128xf32, #tpu.memory_space<vmem>>, %arg3: memref<1x128xf32, #tpu.memory_space<vmem>>, %arg4: memref<1x128xf32, #tpu.memory_space<vmem>>, %arg5: memref<48x128xf32, #tpu.memory_space<vmem>>, %arg6: memref<1x128xf32, #tpu.memory_space<vmem>>, %arg7: memref<1x128xf32, #tpu.memory_space<vmem>>) attributes {dimension_semantics = [#tpu.dimension_semantics<arbitrary>], iteration_bounds = array<i64: 1>, scalar_prefetch = 0 : i64, scratch_operands = 0 : i64, tpu.core_type = #tpu.core_type<tc>, window_params = [{transform_indices = @transform_0, window_bounds = array<i64: 48, 128>}, {pipeline_mode = #tpu.pipeline_mode<synchronous>, transform_indices = @transform_1, window_bounds = array<i64: 128, 128>}, {pipeline_mode = #tpu.pipeline_mode<synchronous>, transform_indices = @transform_2, window_bounds = array<i64: 1, 128>}, {pipeline_mode = #tpu.pipeline_mode<synchronous>, transform_indices = @transform_3, window_bounds = array<i64: 1, 128>}, {transform_indices = @transform_4, window_bounds = array<i64: 48, 128>}, {pipeline_mode = #tpu.pipeline_mode<synchronous>, transform_indices = @transform_5, window_bounds = array<i64: 1, 128>}, {pipeline_mode = #tpu.pipeline_mode<synchronous>, transform_indices = @transform_6, window_bounds = array<i64: 1, 128>}]} {
    %c0 = arith.constant 0 : index
    %c0_0 = arith.constant 0 : index
    %0 = vector.load %arg1[%c0, %c0_0] : memref<48x128xf32, #tpu.memory_space<vmem>>, vector<48x128xf32>
    %c0_1 = arith.constant 0 : index
    %c0_2 = arith.constant 0 : index
    %1 = vector.load %arg2[%c0_1, %c0_2] : memref<128x128xf32, #tpu.memory_space<vmem>>, vector<128x128xf32>
    %cst = arith.constant dense<0.000000e+00> : vector<48x128xf32>
    %2 = tpu.matmul %0, %1, %cst {dimension_numbers = #tpu.dot_dimension_numbers<[1], [0], [0], [1], [0, 0, 1, 1], [], []>} : vector<48x128xf32>, vector<128x128xf32>, vector<48x128xf32> -> vector<48x128xf32>
    %c0_3 = arith.constant 0 : index
    %c0_4 = arith.constant 0 : index
    %3 = vector.load %arg5[%c0_3, %c0_4] : memref<48x128xf32, #tpu.memory_space<vmem>>, vector<48x128xf32>
    tpu.vector_store %arg5[%c0_3, %c0_4], %2 {strides = array<i32>} : memref<48x128xf32, #tpu.memory_space<vmem>>, vector<48x128xf32>,
    %c0_i32 = arith.constant 0 : i32
    %4 = arith.cmpi eq, %arg0, %c0_i32 : i32
    %5 = arith.extui %4 : i1 to i32
    %c0_i32_5 = arith.constant 0 : i32
    %6 = arith.cmpi ne, %5, %c0_i32_5 : i32
    scf.if %6 {
      %cst_16 = arith.constant 0.000000e+00 : f32
      %18 = vector.broadcast %cst_16 : f32 to vector<1x128xf32>
      %c0_17 = arith.constant 0 : index
      %c0_18 = arith.constant 0 : index
      %19 = vector.load %arg6[%c0_17, %c0_18] : memref<1x128xf32, #tpu.memory_space<vmem>>, vector<1x128xf32>
      tpu.vector_store %arg6[%c0_17, %c0_18], %18 {strides = array<i32>} : memref<1x128xf32, #tpu.memory_space<vmem>>, vector<1x128xf32>,
      %cst_19 = arith.constant 0.000000e+00 : f32
      %20 = vector.broadcast %cst_19 : f32 to vector<1x128xf32>
      %c0_20 = arith.constant 0 : index
      %c0_21 = arith.constant 0 : index
      %21 = vector.load %arg7[%c0_20, %c0_21] : memref<1x128xf32, #tpu.memory_space<vmem>>, vector<1x128xf32>
      tpu.vector_store %arg7[%c0_20, %c0_21], %20 {strides = array<i32>} : memref<1x128xf32, #tpu.memory_space<vmem>>, vector<1x128xf32>,
    } else {
    }
    %c0_6 = arith.constant 0 : index
    %c0_7 = arith.constant 0 : index
    %7 = vector.load %arg6[%c0_6, %c0_7] : memref<1x128xf32, #tpu.memory_space<vmem>>, vector<1x128xf32>
    %cst_8 = arith.constant dense<0.000000e+00> : vector<128xf32>
    %8 = vector.multi_reduction <add>, %2, %cst_8 [0] : vector<48x128xf32> to vector<128xf32>
    %9 = vector.shape_cast %8 : vector<128xf32> to vector<1x128xf32>
    %10 = arith.addf %7, %9 : vector<1x128xf32>
    %c0_9 = arith.constant 0 : index
    %c0_10 = arith.constant 0 : index
    %11 = vector.load %arg6[%c0_9, %c0_10] : memref<1x128xf32, #tpu.memory_space<vmem>>, vector<1x128xf32>
    tpu.vector_store %arg6[%c0_9, %c0_10], %10 {strides = array<i32>} : memref<1x128xf32, #tpu.memory_space<vmem>>, vector<1x128xf32>,
    %c0_11 = arith.constant 0 : index
    %c0_12 = arith.constant 0 : index
    %12 = vector.load %arg7[%c0_11, %c0_12] : memref<1x128xf32, #tpu.memory_space<vmem>>, vector<1x128xf32>
    %13 = arith.mulf %2, %2 : vector<48x128xf32>
    %cst_13 = arith.constant dense<0.000000e+00> : vector<128xf32>
    %14 = vector.multi_reduction <add>, %13, %cst_13 [0] : vector<48x128xf32> to vector<128xf32>
    %15 = vector.shape_cast %14 : vector<128xf32> to vector<1x128xf32>
    %16 = arith.addf %12, %15 : vector<1x128xf32>
    %c0_14 = arith.constant 0 : index
    %c0_15 = arith.constant 0 : index
    %17 = vector.load %arg7[%c0_14, %c0_15] : memref<1x128xf32, #tpu.memory_space<vmem>>, vector<1x128xf32>
    tpu.vector_store %arg7[%c0_14, %c0_15], %16 {strides = array<i32>} : memref<1x128xf32, #tpu.memory_space<vmem>>, vector<1x128xf32>,
    return
  }
  func.func @transform_0(%arg0: i32) -> (i32, i32) {
    %c0_i32 = arith.constant 0 : i32
    %c0_i32_0 = arith.constant 0 : i32
    return %arg0, %c0_i32 : i32, i32
  }
  func.func @transform_1(%arg0: i32) -> (i32, i32) {
    %c0_i32 = arith.constant 0 : i32
    %c0_i32_0 = arith.constant 0 : i32
    %c0_i32_1 = arith.constant 0 : i32
    return %c0_i32, %c0_i32_0 : i32, i32
  }
  func.func @transform_2(%arg0: i32) -> (i32, i32) {
    %c0_i32 = arith.constant 0 : i32
    %c0_i32_0 = arith.constant 0 : i32
    %c0_i32_1 = arith.constant 0 : i32
    return %c0_i32, %c0_i32_0 : i32, i32
  }
  func.func @transform_3(%arg0: i32) -> (i32, i32) {
    %c0_i32 = arith.constant 0 : i32
    %c0_i32_0 = arith.constant 0 : i32
    %c0_i32_1 = arith.constant 0 : i32
    return %c0_i32, %c0_i32_0 : i32, i32
  }
  func.func @transform_4(%arg0: i32) -> (i32, i32) {
    %c0_i32 = arith.constant 0 : i32
    %c0_i32_0 = arith.constant 0 : i32
    return %arg0, %c0_i32 : i32, i32
  }
  func.func @transform_5(%arg0: i32) -> (i32, i32) {
    %c0_i32 = arith.constant 0 : i32
    %c0_i32_0 = arith.constant 0 : i32
    %c0_i32_1 = arith.constant 0 : i32
    return %c0_i32, %c0_i32_0 : i32, i32
  }
  func.func @transform_6(%arg0: i32) -> (i32, i32) {
    %c0_i32 = arith.constant 0 : i32
    %c0_i32_0 = arith.constant 0 : i32
    %c0_i32_1 = arith.constant 0 : i32
    return %c0_i32, %c0_i32_0 : i32, i32
  }
}

</mosaic_0001>

<bundles_post_ra>
// kernel: tpu_custom_call.1
= control target key start
LH: loop header
LB: loop body
LE: loop exit
PB: predicated region body
PF: predicated region fallthrough
CT: control target
= control target key end

     0   :  { %12 = vsyncpa [#allocation3], 0  ;;  %s536_s0 = inlined_call_operand.hbm [shape: f32[48,128], index: 0, kind: input, shape index: {}]   ;;  %s537_s1 = inlined_call_operand.hbm [shape: f32[128,128], index: 1, kind: input, shape index: {}]   ;;  %s538_s2 = inlined_call_operand.vmem [shape: f32[1,128], index: 2, kind: input, shape index: {}]   ;;  %s539_s3 = inlined_call_operand.vmem [shape: f32[1,128], index: 3, kind: input, shape index: {}]   ;;  %s540_s4 = inlined_call_operand.hbm [shape: f32[48,128], index: 4, kind: output, shape index: {0}]   ;;  %s541_s5 = inlined_call_operand.hbm [shape: f32[1,128], index: 5, kind: output, shape index: {1}]   ;;  %s542_s6 = inlined_call_operand.hbm [shape: f32[1,128], index: 6, kind: output, shape index: {2}]  }
   0x1   :  { %13 = vsyncpa [#allocation6], 0 }
   0x2   :  { %14 = vsyncpa [#allocation4], 0 }
   0x3   :  { %15 = vsyncpa [#allocation9], 0  ;;  %s469_s21 = smov [#allocation2]  }
   0x4   :  { %s21_s22 = sshll.u32 %s469_s21, 4  ;;  %s22_s22 = int_to_ptr.vmem [resolvable:$true] %s21_s22 }
   0x5   :  { %s369_s2 = scalar_lea.vmem %s22_s22, 768  ;;  %p374_p1 = scmp.lt.s32.totalorder %s22_s22, %s22_s22 }
   0x6   :  { %p370_p0 = scmp.ne.s32.totalorder %s22_s22, %s369_s2  ;;  %p375_p2 = scmp.lt.s32.totalorder %s369_s2, %s369_s2 }
   0x8   :  { %p376_p3 = por %p375_p2, %p374_p1 }
   0xa   :  { %p377_p4 = pnand %p376_p3, %p370_p0 }
   0xc   :  { %380 = shalt.err (!%p377_p4)
}
   0xd   :  { %s470_s3 = smov 128   ;;  %s471_s23 = smov 8  }
   0xe   :  { %27 = dma.hbm_to_vmem [thread:$0]  %s536_s0, 768, %s22_s22, [#allocation3], %s470_s3, %s470_s3, %s471_s23  }
   0xf   :  { %s472_s26 = smov [#allocation5]  }
  0x10   :  { %s33_s27 = sshll.u32 %s472_s26, 4  ;;  %s34_s27 = int_to_ptr.vmem [resolvable:$true] %s33_s27 }
  0x11   :  { %s389_s28 = scalar_lea.vmem %s34_s27, 2048  ;;  %p394_p6 = scmp.lt.s32.totalorder %s34_s27, %s34_s27 }
  0x12   :  { %p390_p5 = scmp.ne.s32.totalorder %s34_s27, %s389_s28  ;;  %p395_p7 = scmp.lt.s32.totalorder %s389_s28, %s389_s28 }
  0x14   :  { %p396_p8 = por %p395_p7, %p394_p6 }
  0x16   :  { %p397_p9 = pnand %p396_p8, %p390_p5 }
  0x18   :  { %400 = shalt.err (!%p397_p9)
}
  0x19   :  { %39 = dma.hbm_to_vmem [thread:$0]  %s537_s1, 2048, %s34_s27, [#allocation6], %s470_s3, %s470_s3, %s471_s23  }
  0x1a   :  { %461 = dma.done.wait [#allocation3], 768  }
  0x1b   :  { %462 = vsyncadd [#allocation3], 4294966528 }
  0x1c   :  { %463 = dma.done.wait [#allocation6], 2048  }
  0x1d   :  { %464 = vsyncadd [#allocation6], 4294965248  ;;  %v71_v0 = vld [vmem:[#allocation5 + $0x78] sm:$0xff]  ;;  %v70_v1 = vld [vmem:[#allocation5 + $0x70] sm:$0xff]  ;;  %v473_v22 = vmov 0.0   ;;  %s474_s0 = smov [#allocation7]  }
  0x1e   :  { %280 = vmatprep.subr.mxu0 %v71_v0  ;;  %321 = vmatprep.subr.mxu1 %v71_v0  ;;  %v69_v2 = vld [vmem:[#allocation5 + $0x68] sm:$0xff]  ;;  %v68_v3 = vld [vmem:[#allocation5 + $0x60] sm:$0xff]  ;;  %v67_v4 = vld [vmem:[#allocation5 + $0x58] sm:$0xff]  ;;  %177 = vst [vmem:[#allocation8] sm:$0x1] %v473_v22  ;;  %s218_s1 = sshll.u32 %s474_s0, 4  ;;  %s219_s1 = int_to_ptr.vmem [resolvable:$true] %s218_s1 }
  0x1f   :  { %281 = vmatpush3.msra.mxu0 %v71_v0  ;;  %337 = vmatpush3.msra.mxu1 %v71_v0  ;;  %v66_v5 = vld [vmem:[#allocation5 + $0x50] sm:$0xff]  ;;  %v65_v6 = vld [vmem:[#allocation5 + $0x48] sm:$0xff]  ;;  %v64_v7 = vld [vmem:[#allocation5 + $0x40] sm:$0xff]  ;;  %178 = vst [vmem:[#allocation10] sm:$0x1] %v473_v22  ;;  %s401_s7 = scalar_lea.vmem %s219_s1, 768  ;;  %p406_p11 = scmp.lt.s32.totalorder %s219_s1, %s219_s1 }
  0x20   :  { %282 = vmatprep.subr.mxu0 %v70_v1  ;;  %322 = vmatprep.subr.mxu1 %v70_v1  ;;  %v63_v8 = vld [vmem:[#allocation5 + $0x38] sm:$0xff]  ;;  %v62_v9 = vld [vmem:[#allocation5 + $0x30] sm:$0xff]  ;;  %v61_v10 = vld [vmem:[#allocation5 + $0x28] sm:$0xff]  ;;  %p402_p10 = scmp.ne.s32.totalorder %s219_s1, %s401_s7  ;;  %p407_p12 = scmp.lt.s32.totalorder %s401_s7, %s401_s7 }
  0x21   :  { %283 = vmatpush3.msra.mxu0 %v70_v1  ;;  %338 = vmatpush3.msra.mxu1 %v70_v1  ;;  %v60_v11 = vld [vmem:[#allocation5 + $0x20] sm:$0xff]  ;;  %v59_v12 = vld [vmem:[#allocation5 + $0x18] sm:$0xff]  ;;  %v58_v13 = vld [vmem:[#allocation5 + $0x10] sm:$0xff] }
  0x22   :  { %284 = vmatprep.subr.mxu0 %v69_v2  ;;  %323 = vmatprep.subr.mxu1 %v69_v2  ;;  %v57_v14 = vld [vmem:[#allocation5 + $0x8] sm:$0xff]  ;;  %v56_v15 = vld [vmem:[#allocation5] sm:$0xff]  ;;  %v50_v16 = vld [vmem:[#allocation2] sm:$0xff]  ;;  %p408_p13 = por %p407_p12, %p406_p11 }
  0x23   :  { %285 = vmatpush3.msra.mxu0 %v69_v2  ;;  %339 = vmatpush3.msra.mxu1 %v69_v2  ;;  %v52_v17 = vld [vmem:[#allocation2 + $0x10] sm:$0xff]  ;;  %v51_v18 = vld [vmem:[#allocation2 + $0x8] sm:$0xff]  ;;  %v53_v19 = vld [vmem:[#allocation2 + $0x18] sm:$0xff] }
  0x24   :  { %286 = vmatprep.subr.mxu0 %v68_v3  ;;  %324 = vmatprep.subr.mxu1 %v68_v3  ;;  %v54_v20 = vld [vmem:[#allocation2 + $0x20] sm:$0xff]  ;;  %v55_v21 = vld [vmem:[#allocation2 + $0x28] sm:$0xff]  ;;  %p409_p0 = pnand %p408_p13, %p402_p10 }
  0x25   :  { %287 = vmatpush3.msra.mxu0 %v68_v3  ;;  %340 = vmatpush3.msra.mxu1 %v68_v3 }
  0x26   :  { %288 = vmatprep.subr.mxu0 %v67_v4  ;;  %325 = vmatprep.subr.mxu1 %v67_v4 }
  0x27   :  { %289 = vmatpush3.msra.mxu0 %v67_v4  ;;  %341 = vmatpush3.msra.mxu1 %v67_v4 }
  0x28   :  { %290 = vmatprep.subr.mxu0 %v66_v5  ;;  %326 = vmatprep.subr.mxu1 %v66_v5 }
  0x29   :  { %291 = vmatpush3.msra.mxu0 %v66_v5  ;;  %342 = vmatpush3.msra.mxu1 %v66_v5 }
  0x2a   :  { %292 = vmatprep.subr.mxu0 %v65_v6  ;;  %327 = vmatprep.subr.mxu1 %v65_v6 }
  0x2b   :  { %293 = vmatpush3.msra.mxu0 %v65_v6  ;;  %343 = vmatpush3.msra.mxu1 %v65_v6 }
  0x2c   :  { %294 = vmatprep.subr.mxu0 %v64_v7  ;;  %328 = vmatprep.subr.mxu1 %v64_v7 }
  0x2d   :  { %295 = vmatpush3.msra.mxu0 %v64_v7  ;;  %344 = vmatpush3.msra.mxu1 %v64_v7 }
  0x2e   :  { %296 = vmatprep.subr.mxu0 %v63_v8  ;;  %329 = vmatprep.subr.mxu1 %v63_v8 }
  0x2f   :  { %297 = vmatpush3.msra.mxu0 %v63_v8  ;;  %345 = vmatpush3.msra.mxu1 %v63_v8 }
  0x30   :  { %298 = vmatprep.subr.mxu0 %v62_v9  ;;  %330 = vmatprep.subr.mxu1 %v62_v9 }
  0x31   :  { %299 = vmatpush3.msra.mxu0 %v62_v9  ;;  %346 = vmatpush3.msra.mxu1 %v62_v9 }
  0x32   :  { %300 = vmatprep.subr.mxu0 %v61_v10  ;;  %331 = vmatprep.subr.mxu1 %v61_v10 }
  0x33   :  { %301 = vmatpush3.msra.mxu0 %v61_v10  ;;  %347 = vmatpush3.msra.mxu1 %v61_v10 }
  0x34   :  { %302 = vmatprep.subr.mxu0 %v60_v11  ;;  %332 = vmatprep.subr.mxu1 %v60_v11 }
  0x35   :  { %303 = vmatpush3.msra.mxu0 %v60_v11  ;;  %348 = vmatpush3.msra.mxu1 %v60_v11 }
  0x36   :  { %304 = vmatprep.subr.mxu0 %v59_v12  ;;  %333 = vmatprep.subr.mxu1 %v59_v12 }
  0x37   :  { %305 = vmatpush3.msra.mxu0 %v59_v12  ;;  %349 = vmatpush3.msra.mxu1 %v59_v12 }
  0x38   :  { %306 = vmatprep.subr.mxu0 %v58_v13  ;;  %334 = vmatprep.subr.mxu1 %v58_v13 }
  0x39   :  { %307 = vmatpush3.msra.mxu0 %v58_v13  ;;  %350 = vmatpush3.msra.mxu1 %v58_v13 }
  0x3a   :  { %308 = vmatprep.subr.mxu0 %v57_v14  ;;  %335 = vmatprep.subr.mxu1 %v57_v14 }
  0x3b   :  { %309 = vmatpush3.msra.mxu0 %v57_v14  ;;  %351 = vmatpush3.msra.mxu1 %v57_v14 }
  0x3c   :  { %310 = vmatprep.subr.mxu0 %v56_v15  ;;  %336 = vmatprep.subr.mxu1 %v56_v15 }
  0x3d   :  { %311 = vmatpush3.msra.mxu0 %v56_v15  ;;  %352 = vmatpush3.msra.mxu1 %v56_v15 }
  0x3e   :  { %312 = vmatprep.mubr.f32.mxu0 %v50_v16  ;;  %315 = vmatprep.mubr.f32.mxu1 %v52_v17 }
  0x3f   :  { %313 = vmatmul.mubr.f32.vlgmr.msra.gmra.mxu0 %v51_v18  ;;  %316 = vmatmul.mubr.f32.vlgmr.msra.gmra.mxu1 %v53_v19 }
  0x40   :  { %318 = vmatprep.mubr.f32.mxu1 %v54_v20 }
  0x43   :  { %319 = vmatmul.mubr.f32.gmra.mxu1 %v55_v21 }
  0xff   :  { %v314_v23 = vpop.f32.mrf.mxu0  ;;  %v317_v24 = vpop.f32.mrf.mxu1 }
 0x100   :  { %168 = vst [vmem:[#allocation7 + $0x8] sm:$0xff] %v314_v23  ;;  %170 = vst [vmem:[#allocation7 + $0x18] sm:$0xff] %v317_v24  ;;  %v195_v27 = vmul.f32 %v314_v23, %v314_v23  ;;  %v197_v35 = vmul.f32 %v317_v24, %v317_v24 }
 0x101   :  { %v138_v25 = vpop.f32.mrf.mxu0  ;;  %v148_v26 = vpop.f32.mrf.mxu1 }
 0x102   :  { %167 = vst [vmem:[#allocation7] sm:$0xff] %v138_v25  ;;  %v180_v28 = vadd.f32 %v314_v23, %v138_v25  ;;  %v194_v29 = vmul.f32 %v138_v25, %v138_v25  ;;  %169 = vst [vmem:[#allocation7 + $0x10] sm:$0xff] %v148_v26  ;;  %v196_v33 = vmul.f32 %v148_v26, %v148_v26 }
 0x103   :  { %v320_v30 = vpop.f32.mrf.mxu1 }
 0x104   :  { %v200_v31 = vadd.f32 %v195_v27, %v194_v29  ;;  %v181_v32 = vadd.f32 %v180_v28, %v148_v26  ;;  %172 = vst [vmem:[#allocation7 + $0x28] sm:$0xff] %v320_v30 }
 0x105   :  { %v158_v34 = vpop.f32.mrf.mxu1 }
 0x106   :  { %v201_v36 = vadd.f32 %v200_v31, %v196_v33  ;;  %171 = vst [vmem:[#allocation7 + $0x20] sm:$0xff] %v158_v34  ;;  %v182_v37 = vadd.f32 %v317_v24, %v181_v32 }
 0x107   :  { %412 = shalt.err (!%p409_p0)
}
 0x108   :  { %224 = dma.vmem_to_hbm [thread:$0]  %s219_s1, 768, %s540_s4, [#allocation4], %s470_s3, %s470_s3, %s471_s23   ;;  %v183_v38 = vadd.f32 %v182_v37, %v158_v34  ;;  %v198_v39 = vmul.f32 %v158_v34, %v158_v34  ;;  %v202_v40 = vadd.f32 %v201_v36, %v197_v35  ;;  %v199_v41 = vmul.f32 %v320_v30, %v320_v30  ;;  %v179_v54 = vld [vmem:[#allocation8] sm:$0x1]  ;;  %v193_v57 = vld [vmem:[#allocation10] sm:$0x1] }
 0x109   :  { %s475_s10 = smov [#allocation8]   ;;  %s476_s4 = smov [#allocation10]  }
 0x10a   :  { %v184_v42 = vadd.f32 %v320_v30, %v183_v38  ;;  %v203_v43 = vadd.f32 %v202_v40, %v198_v39  ;;  %s231_s11 = sshll.u32 %s475_s10, 4  ;;  %s241_s12 = sshll.u32 %s476_s4, 4  ;;  %s232_s11 = int_to_ptr.vmem [resolvable:$true] %s231_s11  ;;  %s242_s12 = int_to_ptr.vmem [resolvable:$true] %s241_s12 }
 0x10b   :  { %s421_s13 = scalar_lea.vmem %s232_s11, 16  ;;  %s425_s14 = scalar_lea.vmem %s232_s11, 32 }
 0x10c   :  { %v185_v44 = vrot.slane %v184_v42, 4  ;;  %v204_v45 = vadd.f32 %v203_v43, %v199_v41  ;;  %p422_p1 = scmp.ne.s32.totalorder %s232_s11, %s421_s13  ;;  %p426_p2 = scmp.lt.s32.totalorder %s232_s11, %s232_s11 }
 0x10d   :  { %p427_p3 = scmp.lt.s32.totalorder %s425_s14, %s421_s13 }
 0x10e   :  { %v186_v46 = vadd.f32 %v185_v44, %v184_v42  ;;  %v205_v47 = vrot.slane %v204_v45, 4 }
 0x10f   :  { %p428_p4 = por %p427_p3, %p426_p2 }
 0x110   :  { %v187_v48 = vrot.slane %v186_v46, 2  ;;  %v206_v49 = vadd.f32 %v205_v47, %v204_v45 }
 0x111   :  { %p429_p5 = pnand %p428_p4, %p422_p1 }
 0x112   :  { %v188_v50 = vadd.f32 %v187_v48, %v186_v46  ;;  %v207_v51 = vrot.slane %v206_v49, 2 }
 0x114   :  { %v189_v52 = vrot.slane %v188_v50, 1  ;;  %v208_v53 = vadd.f32 %v207_v51, %v206_v49 }
 0x116   :  { %v209_v55 = vrot.slane %v208_v53, 1  ;;  %v190_v56 = vadd.f32 %v189_v52, %v188_v50 }
 0x118   :  { %v191_v58 = vadd.f32 %v190_v56, %v179_v54  ;;  %v210_v59 = vadd.f32 %v209_v55, %v208_v53 }
 0x11a   :  { %192 = vst [vmem:[#allocation8] sm:$0x1] %v191_v58  ;;  %v211_v60 = vadd.f32 %v210_v59, %v193_v57 }
 0x11b   :  { %432 = shalt.err (!%p429_p5)
}
 0x11c   :  { %234 = dma.vmem_to_hbm [thread:$0]  %s232_s11, 16, %s541_s5, [#allocation9]   ;;  %212 = vst [vmem:[#allocation10] sm:$0x1] %v211_v60 }
 0x11d   :  { %s441_s17 = scalar_lea.vmem %s242_s12, 16  ;;  %s445_s18 = scalar_lea.vmem %s242_s12, 32 }
 0x11e   :  { %p442_p6 = scmp.ne.s32.totalorder %s242_s12, %s441_s17  ;;  %p446_p7 = scmp.lt.s32.totalorder %s242_s12, %s242_s12 }
 0x11f   :  { %p447_p8 = scmp.lt.s32.totalorder %s445_s18, %s441_s17 }
 0x121   :  { %p448_p9 = por %p447_p8, %p446_p7 }
 0x123   :  { %p449_p10 = pnand %p448_p9, %p442_p6 }
 0x125   :  { %452 = shalt.err (!%p449_p10)
}
 0x126   :  { %244 = dma.vmem_to_hbm [thread:$0]  %s242_s12, 16, %s542_s6, [#allocation9]  }
 0x127   :  { %465 = dma.done.wait [#allocation4], 768  }
 0x128   :  { %466 = vsyncadd [#allocation4], 4294966528 }
 0x129   :  { %467 = dma.done.wait [#allocation9], 32  }
 0x12a   :  { %468 = vsyncadd [#allocation9], 4294967264 }
 0x12b   :  { %254 = vsyncpa [#allocation3], 1 }
 0x12c   :  { %255 = vsyncpa [#allocation6], 1 }
 0x12d   :  { %256 = vsyncpa [#allocation4], 1 }
 0x12e   :  { %257 = vsyncpa [#allocation9], 1 }

</bundles_post_ra>
